<compile_context>
chip_gen: v5e
topology: v5e:2x2
jax: 0.10.0
libtpu: 0.0.40
codegen_flags: <defaults>
</compile_context>

<pallas_src>
import functools
import math

import jax
import jax.numpy as jnp
from jax.experimental import pallas as pl
from jax.experimental.pallas import tpu as pltpu


def _round_up(v, m):
    return ((v + m - 1) // m) * m


def _conv1d_block_kernel(*refs, kernel_size, dilation, left_pad, tile_t,
                         hb_l, hb_r, seq_len, eps, mm_dtype,
                         has_left, has_right):
    it = iter(refs)
    xl_ref = next(it) if has_left else None
    xc_ref = next(it)
    xr_ref = next(it) if has_right else None
    w1_ref = next(it)          # (Cin, Cc)  mm_dtype
    wd_ref = next(it)          # (K, Cc)    f32
    ws_ref = next(it)          # (Cc, Cin)  mm_dtype
    pp_ref = next(it)          # (8, Cc)    f32: [b1, g1, be1, bd, g2, be2, 0, 0]
    bs_ref = next(it)          # (1, Cin)   f32
    al_ref = next(it)          # (2,)       f32 in SMEM: [alpha1, alpha2]
    o_ref = next(it)

    t = pl.program_id(1)

    xc = xc_ref[0]                                   # (tile_t, Cin) f32
    pieces = []
    if has_left:
        pieces.append(xl_ref[0])                     # (hb_l, Cin)
    pieces.append(xc)
    if has_right:
        pieces.append(xr_ref[0])                     # (hb_r, Cin)
    # All pieces are sublane-aligned (multiples of 8 rows) -> cheap concat.
    x_ext = pieces[0] if len(pieces) == 1 else jnp.concatenate(pieces, axis=0)

    pp = pp_ref[...]
    b1, g1, be1 = pp[0:1, :], pp[1:2, :], pp[2:3, :]
    bd, g2, be2 = pp[3:4, :], pp[4:5, :], pp[5:6, :]

    # --- conv1x1 (pointwise): big-M MXU matmul over tile + halo --------------
    y = jnp.dot(x_ext.astype(mm_dtype), w1_ref[...],
                preferred_element_type=jnp.float32) + b1

    # --- PReLU 1 --------------------------------------------------------------
    a1 = al_ref[0]
    y = jnp.where(y >= 0.0, y, a1 * y)

    # --- channel-wise LayerNorm 1 (lane reduction), one-pass stats -----------
    mu = jnp.mean(y, axis=-1, keepdims=True)
    ms = jnp.mean(y * y, axis=-1, keepdims=True)
    var = jnp.maximum(ms - mu * mu, 0.0)
    y = (y - mu) * jax.lax.rsqrt(var + eps) * g1 + be1

    # Zero rows outside the real sequence [0, seq_len): exactly the zero
    # padding PyTorch's depthwise conv applies to its input (LN1 output).
    # Also neutralizes whatever data the clamped boundary-halo blocks carried.
    row = jax.lax.broadcasted_iota(jnp.int32, y.shape, 0)
    real = t * tile_t - hb_l + row
    y = jnp.where((real >= 0) & (real < seq_len), y, 0.0)

    # --- depthwise conv (groups == channels), dilated -------------------------
    base = hb_l - left_pad                           # >= 0 by construction
    wd = wd_ref[...]
    yd = y[base:base + tile_t, :] * wd[0:1, :]
    for k in range(1, kernel_size):                  # K is tiny & static
        off = base + k * dilation
        yd = yd + y[off:off + tile_t, :] * wd[k:k + 1, :]
    yd = yd + bd

    # --- PReLU 2 --------------------------------------------------------------
    a2 = al_ref[1]
    yd = jnp.where(yd >= 0.0, yd, a2 * yd)

    # --- channel-wise LayerNorm 2 ---------------------------------------------
    mu2 = jnp.mean(yd, axis=-1, keepdims=True)
    ms2 = jnp.mean(yd * yd, axis=-1, keepdims=True)
    var2 = jnp.maximum(ms2 - mu2 * mu2, 0.0)
    yd = (yd - mu2) * jax.lax.rsqrt(var2 + eps) * g2 + be2

    # --- sconv (pointwise back to Cin) + residual -----------------------------
    out = jnp.dot(yd.astype(mm_dtype), ws_ref[...],
                  preferred_element_type=jnp.float32) + bs_ref[...]
    o_ref[0] = (xc + out).astype(o_ref.dtype)


def conv1d_block_ntc(x_ntc, params, *, kernel_size=3, dilation=1, causal=False,
                     tile_t=None, matmul_dtype=jnp.bfloat16):
    """x_ntc: (N, T, Cin) — channels-last layout for stacked TCN blocks."""
    N, T, Cin = x_ntc.shape
    Cc = params["w1"].shape[1]

    if (not causal) and kernel_size % 2 == 0:
        # PyTorch's symmetric padding only reproduces length T for odd K.
        raise ValueError("non-causal Conv1DBlock requires an odd kernel_size")

    left_pad = dilation * (kernel_size - 1) if causal \
        else dilation * (kernel_size - 1) // 2
    right_pad = 0 if causal else left_pad

    # Sublane-aligned halo sizes (per side); causal blocks need no right halo.
    hb_l = _round_up(left_pad, 8) if left_pad > 0 else 0
    hb_r = _round_up(right_pad, 8) if right_pad > 0 else 0
    has_left, has_right = hb_l > 0, hb_r > 0

    align = 8
    for h in (hb_l, hb_r):
        if h:
            align = (align * h) // math.gcd(align, h)

    if tile_t is None:
        # Keep halo recompute under ~12.5% of the tile; cap for v7x VMEM.
        tile_t = min(max(1024, 8 * (hb_l + hb_r)), 2048)
    tt = _round_up(min(tile_t, _round_up(T, 8)), align)
    num_t = -(-T // tt)
    t_c = num_t * tt

    x = x_ntc.astype(jnp.float32)
    if t_c > T:                                   # tail pad only when needed
        x = jnp.pad(x, ((0, 0), (0, t_c - T), (0, 0)))

    # Pre-cast MXU operands once (wrapper), keep VPU-side params in f32.
    w1 = params["w1"].astype(matmul_dtype)
    ws = params["ws"].astype(matmul_dtype)
    wd = params["wd"].astype(jnp.float32)
    bs = params["bs"].astype(jnp.float32)
    pp = jnp.concatenate(
        [params["b1"], params["gamma1"], params["beta1"],
         params["bd"], params["gamma2"], params["beta2"],
         jnp.zeros((2, Cc), jnp.float32)], axis=0).astype(jnp.float32)
    alphas = jnp.concatenate(
        [params["alpha1"].reshape(-1),
         params["alpha2"].reshape(-1)]).astype(jnp.float32)

    kern = functools.partial(
        _conv1d_block_kernel,
        kernel_size=kernel_size, dilation=dilation, left_pad=left_pad,
        tile_t=tt, hb_l=hb_l, hb_r=hb_r, seq_len=T, eps=1e-5,
        mm_dtype=matmul_dtype, has_left=has_left, has_right=has_right)

    def rep(shape):
        # Replicated parameter: same block every grid step (fetched once).
        return pl.BlockSpec(shape, lambda n, t: (0,) * len(shape))

    in_specs = []
    operands = []
    if has_left:
        ratio_l = tt // hb_l
        # rows [t*tt - hb_l, t*tt); t == 0 clamps to block 0 (rows masked).
        in_specs.append(pl.BlockSpec(
            (1, hb_l, Cin),
            lambda n, t: (n, jnp.maximum(t * ratio_l - 1, 0), 0)))
        operands.append(x)
    in_specs.append(pl.BlockSpec((1, tt, Cin), lambda n, t: (n, t, 0)))
    operands.append(x)
    if has_right:
        ratio_r = tt // hb_r
        nbr = t_c // hb_r
        # rows [(t+1)*tt, (t+1)*tt + hb_r); last tile clamps (rows masked).
        in_specs.append(pl.BlockSpec(
            (1, hb_r, Cin),
            lambda n, t: (n, jnp.minimum((t + 1) * ratio_r, nbr - 1), 0)))
        operands.append(x)
    in_specs += [
        rep((Cin, Cc)),                          # w1 (mm dtype)
        rep((kernel_size, Cc)),                  # wd
        rep((Cc, Cin)),                          # ws (mm dtype)
        rep((8, Cc)),                            # packed per-channel params
        rep((1, Cin)),                           # bs
        pl.BlockSpec(memory_space=pltpu.SMEM),   # [alpha1, alpha2]
    ]
    operands += [w1, wd, ws, pp, bs, alphas]

    out = pl.pallas_call(
        kern,
        out_shape=jax.ShapeDtypeStruct((N, t_c, Cin), jnp.float32),
        grid=(N, num_t),
        in_specs=in_specs,
        out_specs=pl.BlockSpec((1, tt, Cin), lambda n, t: (n, t, 0)),
        compiler_params=pltpu.CompilerParams(
            dimension_semantics=("parallel", "parallel"),
            vmem_limit_bytes=48 * 1024 * 1024),
    )(*operands)

    return out[:, :T, :] if t_c > T else out


def conv1d_block(x_nct, params, *, kernel_size=3, dilation=1, causal=False,
                 tile_t=None, matmul_dtype=jnp.bfloat16):
    """PyTorch-layout wrapper: x_nct (N, Cin, T) -> (N, Cin, T).
    For stacked blocks prefer conv1d_block_ntc to transpose once per network."""
    x_ntc = jnp.transpose(x_nct, (0, 2, 1))
    out = conv1d_block_ntc(x_ntc, params, kernel_size=kernel_size,
                           dilation=dilation, causal=causal, tile_t=tile_t,
                           matmul_dtype=matmul_dtype)
    return jnp.transpose(out, (0, 2, 1))


def conv1d_block_ref(x_nct, params, *, kernel_size=3, dilation=1, causal=False,
                     matmul_dtype=jnp.float32):
    """Pure-JAX reference mirroring PyTorch Conv1DBlock semantics."""
    eps = 1e-5
    md = matmul_dtype
    dconv_pad = (dilation * (kernel_size - 1) // 2) if not causal \
        else dilation * (kernel_size - 1)
    left_pad = dconv_pad
    right_pad = 0 if causal else dconv_pad
    x = jnp.transpose(x_nct, (0, 2, 1)).astype(jnp.float32)          # (N, T, Cin)
    T = x.shape[1]

    y = jnp.einsum("ntc,cd->ntd", x.astype(md), params["w1"].astype(md),
                   preferred_element_type=jnp.float32) + params["b1"]
    y = jnp.where(y >= 0, y, params["alpha1"][0, 0] * y)
    mu = jnp.mean(y, -1, keepdims=True)
    var = jnp.mean((y - mu) ** 2, -1, keepdims=True)
    y = (y - mu) / jnp.sqrt(var + eps) * params["gamma1"] + params["beta1"]

    ypad = jnp.pad(y, ((0, 0), (left_pad, right_pad), (0, 0)))
    yd = sum(ypad[:, k * dilation:k * dilation + T, :] * params["wd"][k][None, None, :]
             for k in range(kernel_size)) + params["bd"]
    yd = jnp.where(yd >= 0, yd, params["alpha2"][0, 0] * yd)
    mu2 = jnp.mean(yd, -1, keepdims=True)
    var2 = jnp.mean((yd - mu2) ** 2, -1, keepdims=True)
    yd = (yd - mu2) / jnp.sqrt(var2 + eps) * params["gamma2"] + params["beta2"]

    out = jnp.einsum("ntd,dc->ntc", yd.astype(md), params["ws"].astype(md),
                     preferred_element_type=jnp.float32) + params["bs"]
    return jnp.transpose(x + out, (0, 2, 1))


if __name__ == "__main__":
    def make_params(key, cin, cc, k):
        ks = jax.random.split(key, 10)
        return {
            "w1":     0.1 * jax.random.normal(ks[0], (cin, cc), jnp.float32),
            "b1":     0.1 * jax.random.normal(ks[1], (1, cc), jnp.float32),
            "alpha1": jnp.full((1, 1), 0.25, jnp.float32),
            "gamma1": 1.0 + 0.1 * jax.random.normal(ks[2], (1, cc), jnp.float32),
            "beta1":  0.1 * jax.random.normal(ks[3], (1, cc), jnp.float32),
            "wd":     0.1 * jax.random.normal(ks[4], (k, cc), jnp.float32),
            "bd":     0.1 * jax.random.normal(ks[5], (1, cc), jnp.float32),
            "alpha2": jnp.full((1, 1), 0.25, jnp.float32),
            "gamma2": 1.0 + 0.1 * jax.random.normal(ks[6], (1, cc), jnp.float32),
            "beta2":  0.1 * jax.random.normal(ks[7], (1, cc), jnp.float32),
            "ws":     0.1 * jax.random.normal(ks[8], (cc, cin), jnp.float32),
            "bs":     0.1 * jax.random.normal(ks[9], (1, cin), jnp.float32),
        }

    root = jax.random.PRNGKey(0)
    kp, kx1, kx2 = jax.random.split(root, 3)

    N, Cin, Cc, K = 2, 32, 64, 3
    params = make_params(kp, Cin, Cc, K)

    # 1) non-causal, dilation=1, small explicit tile -> multi-tile halo path,
    #    f32 matmuls for exact comparison against the f32 reference.
    T1 = 32
    x1 = jax.random.normal(kx1, (N, Cin, T1), jnp.float32)
    out1 = jax.block_until_ready(
        conv1d_block(x1, params, kernel_size=K, dilation=1, causal=False,
                     tile_t=8, matmul_dtype=jnp.float32))
    ref1 = conv1d_block_ref(x1, params, kernel_size=K, dilation=1, causal=False)
    assert out1.shape == (N, Cin, T1)
    err1 = float(jnp.max(jnp.abs(out1 - ref1)))
    assert jnp.allclose(out1, ref1, atol=1e-4, rtol=1e-4), f"test1 max abs err {err1}"

    # 2) causal, dilation=2, T not a multiple of the tile (tail-pad path,
    #    right halo dropped entirely).
    T2 = 20
    x2 = jax.random.normal(kx2, (N, Cin, T2), jnp.float32)
    out2 = jax.block_until_ready(
        conv1d_block(x2, params, kernel_size=K, dilation=2, causal=True,
                     tile_t=16, matmul_dtype=jnp.float32))
    ref2 = conv1d_block_ref(x2, params, kernel_size=K, dilation=2, causal=True)
    assert out2.shape == (N, Cin, T2)
    err2 = float(jnp.max(jnp.abs(out2 - ref2)))
    assert jnp.allclose(out2, ref2, atol=1e-4, rtol=1e-4), f"test2 max abs err {err2}"

    # 3) defaults: auto tile, bf16 MXU operands (the production-fast path).
    out3 = jax.block_until_ready(
        conv1d_block(x1, params, kernel_size=K, dilation=1, causal=False))
    ref3 = conv1d_block_ref(x1, params, kernel_size=K, dilation=1, causal=False,
                            matmul_dtype=jnp.bfloat16)
    err3 = float(jnp.max(jnp.abs(out3 - ref3)))
    assert jnp.allclose(out3, ref3, atol=1e-3, rtol=1e-3), f"test3 max abs err {err3}"

    print("KERNEL_OK")
</pallas_src>

<mosaic_0001>
module attributes {stable_mosaic.version = 11 : i64} {
  func.func @_conv1d_block_kernel(%arg0: i32, %arg1: i32, %arg2: memref<1x8x32xf32, #tpu.memory_space<vmem>>, %arg3: memref<1x8x32xf32, #tpu.memory_space<vmem>>, %arg4: memref<1x8x32xf32, #tpu.memory_space<vmem>>, %arg5: memref<32x64xf32, #tpu.memory_space<vmem>>, %arg6: memref<3x64xf32, #tpu.memory_space<vmem>>, %arg7: memref<64x32xf32, #tpu.memory_space<vmem>>, %arg8: memref<8x64xf32, #tpu.memory_space<vmem>>, %arg9: memref<1x32xf32, #tpu.memory_space<vmem>>, %arg10: memref<2xf32, #tpu.memory_space<smem>>, %arg11: memref<1x8x32xf32, #tpu.memory_space<vmem>>) attributes {dimension_semantics = [#tpu.dimension_semantics<parallel>, #tpu.dimension_semantics<parallel>], iteration_bounds = array<i64: 2, 4>, scalar_prefetch = 0 : i64, scratch_operands = 0 : i64, tpu.core_type = #tpu.core_type<tc>, window_params = [{transform_indices = @transform_0, window_bounds = array<i64: 1, 8, 32>}, {transform_indices = @transform_1, window_bounds = array<i64: 1, 8, 32>}, {transform_indices = @transform_2, window_bounds = array<i64: 1, 8, 32>}, {pipeline_mode = #tpu.pipeline_mode<synchronous>, transform_indices = @transform_3, window_bounds = array<i64: 32, 64>}, {pipeline_mode = #tpu.pipeline_mode<synchronous>, transform_indices = @transform_4, window_bounds = array<i64: 3, 64>}, {pipeline_mode = #tpu.pipeline_mode<synchronous>, transform_indices = @transform_5, window_bounds = array<i64: 64, 32>}, {pipeline_mode = #tpu.pipeline_mode<synchronous>, transform_indices = @transform_6, window_bounds = array<i64: 8, 64>}, {pipeline_mode = #tpu.pipeline_mode<synchronous>, transform_indices = @transform_7, window_bounds = array<i64: 1, 32>}, {transform_indices = @transform_8, window_bounds = array<i64: 2>}, {transform_indices = @transform_9, window_bounds = array<i64: 1, 8, 32>}]} {
    %c0 = arith.constant 0 : index
    %c0_0 = arith.constant 0 : index
    %c0_1 = arith.constant 0 : index
    %0 = vector.load %arg3[%c0, %c0_0, %c0_1] : memref<1x8x32xf32, #tpu.memory_space<vmem>>, vector<1x8x32xf32>
    %1 = vector.shape_cast %0 : vector<1x8x32xf32> to vector<8x32xf32>
    %c0_2 = arith.constant 0 : index
    %c0_3 = arith.constant 0 : index
    %c0_4 = arith.constant 0 : index
    %2 = vector.load %arg2[%c0_2, %c0_3, %c0_4] : memref<1x8x32xf32, #tpu.memory_space<vmem>>, vector<1x8x32xf32>
    %3 = vector.shape_cast %2 : vector<1x8x32xf32> to vector<8x32xf32>
    %c0_5 = arith.constant 0 : index
    %c0_6 = arith.constant 0 : index
    %c0_7 = arith.constant 0 : index
    %4 = vector.load %arg4[%c0_5, %c0_6, %c0_7] : memref<1x8x32xf32, #tpu.memory_space<vmem>>, vector<1x8x32xf32>
    %5 = vector.shape_cast %4 : vector<1x8x32xf32> to vector<8x32xf32>
    %6 = tpu.concatenate %3, %1, %5 in 0 : vector<8x32xf32>, vector<8x32xf32>, vector<8x32xf32> -> vector<24x32xf32>
    %c0_8 = arith.constant 0 : index
    %c0_9 = arith.constant 0 : index
    %7 = vector.load %arg8[%c0_8, %c0_9] : memref<8x64xf32, #tpu.memory_space<vmem>>, vector<8x64xf32>
    %8 = vector.extract_strided_slice %7 {offsets = [0, 0], sizes = [1, 64], strides = [1, 1]} : vector<8x64xf32> to vector<1x64xf32>
    %9 = vector.extract_strided_slice %7 {offsets = [1, 0], sizes = [1, 64], strides = [1, 1]} : vector<8x64xf32> to vector<1x64xf32>
    %10 = vector.extract_strided_slice %7 {offsets = [2, 0], sizes = [1, 64], strides = [1, 1]} : vector<8x64xf32> to vector<1x64xf32>
    %11 = vector.extract_strided_slice %7 {offsets = [3, 0], sizes = [1, 64], strides = [1, 1]} : vector<8x64xf32> to vector<1x64xf32>
    %12 = vector.extract_strided_slice %7 {offsets = [4, 0], sizes = [1, 64], strides = [1, 1]} : vector<8x64xf32> to vector<1x64xf32>
    %13 = vector.extract_strided_slice %7 {offsets = [5, 0], sizes = [1, 64], strides = [1, 1]} : vector<8x64xf32> to vector<1x64xf32>
    %c0_10 = arith.constant 0 : index
    %c0_11 = arith.constant 0 : index
    %14 = vector.load %arg5[%c0_10, %c0_11] : memref<32x64xf32, #tpu.memory_space<vmem>>, vector<32x64xf32>
    %cst = arith.constant dense<0.000000e+00> : vector<24x64xf32>
    %15 = tpu.matmul %6, %14, %cst {dimension_numbers = #tpu.dot_dimension_numbers<[1], [0], [0], [1], [0, 0, 1, 1], [], []>} : vector<24x32xf32>, vector<32x64xf32>, vector<24x64xf32> -> vector<24x64xf32>
    %16 = vector.broadcast %8 : vector<1x64xf32> to vector<24x64xf32>
    %17 = arith.addf %15, %16 : vector<24x64xf32>
    %c0_12 = arith.constant 0 : index
    %18 = memref.load %arg10[%c0_12] : memref<2xf32, #tpu.memory_space<smem>>
    %cst_13 = arith.constant 0.000000e+00 : f32
    %19 = vector.broadcast %cst_13 : f32 to vector<24x64xf32>
    %20 = arith.cmpf oge, %17, %19 : vector<24x64xf32>
    %21 = vector.broadcast %18 : f32 to vector<24x64xf32>
    %22 = arith.mulf %21, %17 : vector<24x64xf32>
    %23 = arith.select %20, %17, %22 : vector<24x64xi1>, vector<24x64xf32>
    %cst_14 = arith.constant dense<0.000000e+00> : vector<24xf32>
    %24 = vector.multi_reduction <add>, %23, %cst_14 [1] : vector<24x64xf32> to vector<24xf32>
    %25 = vector.shape_cast %24 : vector<24xf32> to vector<24x1xf32>
    %cst_15 = arith.constant 6.400000e+01 : f32
    %26 = vector.broadcast %cst_15 : f32 to vector<24x1xf32>
    %27 = arith.divf %25, %26 : vector<24x1xf32>
    %28 = arith.mulf %23, %23 : vector<24x64xf32>
    %cst_16 = arith.constant dense<0.000000e+00> : vector<24xf32>
    %29 = vector.multi_reduction <add>, %28, %cst_16 [1] : vector<24x64xf32> to vector<24xf32>
    %30 = vector.shape_cast %29 : vector<24xf32> to vector<24x1xf32>
    %cst_17 = arith.constant 6.400000e+01 : f32
    %31 = vector.broadcast %cst_17 : f32 to vector<24x1xf32>
    %32 = arith.divf %30, %31 : vector<24x1xf32>
    %33 = arith.mulf %27, %27 : vector<24x1xf32>
    %34 = arith.subf %32, %33 : vector<24x1xf32>
    %cst_18 = arith.constant 0.000000e+00 : f32
    %35 = vector.broadcast %cst_18 : f32 to vector<24x1xf32>
    %36 = arith.maximumf %34, %35 : vector<24x1xf32>
    %37 = vector.broadcast %27 : vector<24x1xf32> to vector<24x64xf32>
    %38 = arith.subf %23, %37 : vector<24x64xf32>
    %cst_19 = arith.constant 9.99999974E-6 : f32
    %39 = vector.broadcast %cst_19 : f32 to vector<24x1xf32>
    %40 = arith.addf %36, %39 : vector<24x1xf32>
    %41 = math.rsqrt %40 : vector<24x1xf32>
    %42 = vector.broadcast %41 : vector<24x1xf32> to vector<24x64xf32>
    %43 = arith.mulf %38, %42 : vector<24x64xf32>
    %44 = vector.broadcast %9 : vector<1x64xf32> to vector<24x64xf32>
    %45 = arith.mulf %43, %44 : vector<24x64xf32>
    %46 = vector.broadcast %10 : vector<1x64xf32> to vector<24x64xf32>
    %47 = arith.addf %45, %46 : vector<24x64xf32>
    %48 = tpu.iota {dimensions = array<i32: 0>} : vector<24x64xi32>
    %c8_i32 = arith.constant 8 : i32
    %49 = arith.muli %arg1, %c8_i32 : i32
    %c8_i32_20 = arith.constant 8 : i32
    %50 = arith.subi %49, %c8_i32_20 : i32
    %51 = vector.broadcast %50 : i32 to vector<24x64xi32>
    %52 = arith.addi %51, %48 : vector<24x64xi32>
    %c0_i32 = arith.constant 0 : i32
    %53 = vector.broadcast %c0_i32 : i32 to vector<24x64xi32>
    %54 = arith.cmpi sge, %52, %53 : vector<24x64xi32>
    %c32_i32 = arith.constant 32 : i32
    %55 = vector.broadcast %c32_i32 : i32 to vector<24x64xi32>
    %56 = arith.cmpi slt, %52, %55 : vector<24x64xi32>
    %57 = arith.andi %54, %56 : vector<24x64xi1>
    %cst_21 = arith.constant 0.000000e+00 : f32
    %58 = vector.broadcast %cst_21 : f32 to vector<24x64xf32>
    %59 = arith.select %57, %47, %58 : vector<24x64xi1>, vector<24x64xf32>
    %c0_22 = arith.constant 0 : index
    %c0_23 = arith.constant 0 : index
    %60 = vector.load %arg6[%c0_22, %c0_23] : memref<3x64xf32, #tpu.memory_space<vmem>>, vector<3x64xf32>
    %61 = vector.extract_strided_slice %59 {offsets = [7, 0], sizes = [8, 64], strides = [1, 1]} : vector<24x64xf32> to vector<8x64xf32>
    %62 = vector.extract_strided_slice %60 {offsets = [0, 0], sizes = [1, 64], strides = [1, 1]} : vector<3x64xf32> to vector<1x64xf32>
    %63 = vector.broadcast %62 : vector<1x64xf32> to vector<8x64xf32>
    %64 = arith.mulf %61, %63 : vector<8x64xf32>
    %65 = vector.extract_strided_slice %59 {offsets = [8, 0], sizes = [8, 64], strides = [1, 1]} : vector<24x64xf32> to vector<8x64xf32>
    %66 = vector.extract_strided_slice %60 {offsets = [1, 0], sizes = [1, 64], strides = [1, 1]} : vector<3x64xf32> to vector<1x64xf32>
    %67 = vector.broadcast %66 : vector<1x64xf32> to vector<8x64xf32>
    %68 = arith.mulf %65, %67 : vector<8x64xf32>
    %69 = arith.addf %64, %68 : vector<8x64xf32>
    %70 = vector.extract_strided_slice %59 {offsets = [9, 0], sizes = [8, 64], strides = [1, 1]} : vector<24x64xf32> to vector<8x64xf32>
    %71 = vector.extract_strided_slice %60 {offsets = [2, 0], sizes = [1, 64], strides = [1, 1]} : vector<3x64xf32> to vector<1x64xf32>
    %72 = vector.broadcast %71 : vector<1x64xf32> to vector<8x64xf32>
    %73 = arith.mulf %70, %72 : vector<8x64xf32>
    %74 = arith.addf %69, %73 : vector<8x64xf32>
    %75 = vector.broadcast %11 : vector<1x64xf32> to vector<8x64xf32>
    %76 = arith.addf %74, %75 : vector<8x64xf32>
    %c1 = arith.constant 1 : index
    %77 = memref.load %arg10[%c1] : memref<2xf32, #tpu.memory_space<smem>>
    %cst_24 = arith.constant 0.000000e+00 : f32
    %78 = vector.broadcast %cst_24 : f32 to vector<8x64xf32>
    %79 = arith.cmpf oge, %76, %78 : vector<8x64xf32>
    %80 = vector.broadcast %77 : f32 to vector<8x64xf32>
    %81 = arith.mulf %80, %76 : vector<8x64xf32>
    %82 = arith.select %79, %76, %81 : vector<8x64xi1>, vector<8x64xf32>
    %cst_25 = arith.constant dense<0.000000e+00> : vector<8xf32>
    %83 = vector.multi_reduction <add>, %82, %cst_25 [1] : vector<8x64xf32> to vector<8xf32>
    %84 = vector.shape_cast %83 : vector<8xf32> to vector<8x1xf32>
    %cst_26 = arith.constant 6.400000e+01 : f32
    %85 = vector.broadcast %cst_26 : f32 to vector<8x1xf32>
    %86 = arith.divf %84, %85 : vector<8x1xf32>
    %87 = arith.mulf %82, %82 : vector<8x64xf32>
    %cst_27 = arith.constant dense<0.000000e+00> : vector<8xf32>
    %88 = vector.multi_reduction <add>, %87, %cst_27 [1] : vector<8x64xf32> to vector<8xf32>
    %89 = vector.shape_cast %88 : vector<8xf32> to vector<8x1xf32>
    %cst_28 = arith.constant 6.400000e+01 : f32
    %90 = vector.broadcast %cst_28 : f32 to vector<8x1xf32>
    %91 = arith.divf %89, %90 : vector<8x1xf32>
    %92 = arith.mulf %86, %86 : vector<8x1xf32>
    %93 = arith.subf %91, %92 : vector<8x1xf32>
    %cst_29 = arith.constant 0.000000e+00 : f32
    %94 = vector.broadcast %cst_29 : f32 to vector<8x1xf32>
    %95 = arith.maximumf %93, %94 : vector<8x1xf32>
    %96 = vector.broadcast %86 : vector<8x1xf32> to vector<8x64xf32>
    %97 = arith.subf %82, %96 : vector<8x64xf32>
    %cst_30 = arith.constant 9.99999974E-6 : f32
    %98 = vector.broadcast %cst_30 : f32 to vector<8x1xf32>
    %99 = arith.addf %95, %98 : vector<8x1xf32>
    %100 = math.rsqrt %99 : vector<8x1xf32>
    %101 = vector.broadcast %100 : vector<8x1xf32> to vector<8x64xf32>
    %102 = arith.mulf %97, %101 : vector<8x64xf32>
    %103 = vector.broadcast %12 : vector<1x64xf32> to vector<8x64xf32>
    %104 = arith.mulf %102, %103 : vector<8x64xf32>
    %105 = vector.broadcast %13 : vector<1x64xf32> to vector<8x64xf32>
    %106 = arith.addf %104, %105 : vector<8x64xf32>
    %c0_31 = arith.constant 0 : index
    %c0_32 = arith.constant 0 : index
    %107 = vector.load %arg7[%c0_31, %c0_32] : memref<64x32xf32, #tpu.memory_space<vmem>>, vector<64x32xf32>
    %cst_33 = arith.constant dense<0.000000e+00> : vector<8x32xf32>
    %108 = tpu.matmul %106, %107, %cst_33 {dimension_numbers = #tpu.dot_dimension_numbers<[1], [0], [0], [1], [0, 0, 1, 1], [], []>} : vector<8x64xf32>, vector<64x32xf32>, vector<8x32xf32> -> vector<8x32xf32>
    %c0_34 = arith.constant 0 : index
    %c0_35 = arith.constant 0 : index
    %109 = vector.load %arg9[%c0_34, %c0_35] : memref<1x32xf32, #tpu.memory_space<vmem>>, vector<1x32xf32>
    %110 = vector.broadcast %109 : vector<1x32xf32> to vector<8x32xf32>
    %111 = arith.addf %108, %110 : vector<8x32xf32>
    %112 = arith.addf %1, %111 : vector<8x32xf32>
    %c0_36 = arith.constant 0 : index
    %c0_37 = arith.constant 0 : index
    %c0_38 = arith.constant 0 : index
    %113 = vector.load %arg11[%c0_36, %c0_37, %c0_38] : memref<1x8x32xf32, #tpu.memory_space<vmem>>, vector<1x8x32xf32>
    %114 = vector.shape_cast %113 : vector<1x8x32xf32> to vector<8x32xf32>
    %115 = vector.shape_cast %112 : vector<8x32xf32> to vector<1x8x32xf32>
    tpu.vector_store %arg11[%c0_36, %c0_37, %c0_38], %115 {strides = array<i32>} : memref<1x8x32xf32, #tpu.memory_space<vmem>>, vector<1x8x32xf32>,
    return
  }
  func.func @transform_0(%arg0: i32, %arg1: i32) -> (i32, i32, i32) {
    %c1_i32 = arith.constant 1 : i32
    %0 = arith.muli %arg1, %c1_i32 : i32
    %c1_i32_0 = arith.constant 1 : i32
    %1 = arith.subi %0, %c1_i32_0 : i32
    %c0_i32 = arith.constant 0 : i32
    %2 = arith.maxsi %1, %c0_i32 : i32
    %c0_i32_1 = arith.constant 0 : i32
    %c0_i32_2 = arith.constant 0 : i32
    return %arg0, %2, %c0_i32_1 : i32, i32, i32
  }
  func.func @transform_1(%arg0: i32, %arg1: i32) -> (i32, i32, i32) {
    %c0_i32 = arith.constant 0 : i32
    %c0_i32_0 = arith.constant 0 : i32
    return %arg0, %arg1, %c0_i32 : i32, i32, i32
  }
  func.func @transform_2(%arg0: i32, %arg1: i32) -> (i32, i32, i32) {
    %c1_i32 = arith.constant 1 : i32
    %0 = arith.addi %arg1, %c1_i32 : i32
    %c1_i32_0 = arith.constant 1 : i32
    %1 = arith.muli %0, %c1_i32_0 : i32
    %c3_i32 = arith.constant 3 : i32
    %2 = arith.minsi %1, %c3_i32 : i32
    %c0_i32 = arith.constant 0 : i32
    %c0_i32_1 = arith.constant 0 : i32
    return %arg0, %2, %c0_i32 : i32, i32, i32
  }
  func.func @transform_3(%arg0: i32, %arg1: i32) -> (i32, i32) {
    %c0_i32 = arith.constant 0 : i32
    %c0_i32_0 = arith.constant 0 : i32
    %c0_i32_1 = arith.constant 0 : i32
    return %c0_i32, %c0_i32_0 : i32, i32
  }
  func.func @transform_4(%arg0: i32, %arg1: i32) -> (i32, i32) {
    %c0_i32 = arith.constant 0 : i32
    %c0_i32_0 = arith.constant 0 : i32
    %c0_i32_1 = arith.constant 0 : i32
    return %c0_i32, %c0_i32_0 : i32, i32
  }
  func.func @transform_5(%arg0: i32, %arg1: i32) -> (i32, i32) {
    %c0_i32 = arith.constant 0 : i32
    %c0_i32_0 = arith.constant 0 : i32
    %c0_i32_1 = arith.constant 0 : i32
    return %c0_i32, %c0_i32_0 : i32, i32
  }
  func.func @transform_6(%arg0: i32, %arg1: i32) -> (i32, i32) {
    %c0_i32 = arith.constant 0 : i32
    %c0_i32_0 = arith.constant 0 : i32
    %c0_i32_1 = arith.constant 0 : i32
    return %c0_i32, %c0_i32_0 : i32, i32
  }
  func.func @transform_7(%arg0: i32, %arg1: i32) -> (i32, i32) {
    %c0_i32 = arith.constant 0 : i32
    %c0_i32_0 = arith.constant 0 : i32
    %c0_i32_1 = arith.constant 0 : i32
    return %c0_i32, %c0_i32_0 : i32, i32
  }
  func.func @transform_8(%arg0: i32, %arg1: i32) -> i32 {
    %c0_i32 = arith.constant 0 : i32
    %c0_i32_0 = arith.constant 0 : i32
    return %c0_i32 : i32
  }
  func.func @transform_9(%arg0: i32, %arg1: i32) -> (i32, i32, i32) {
    %c0_i32 = arith.constant 0 : i32
    %c0_i32_0 = arith.constant 0 : i32
    return %arg0, %arg1, %c0_i32 : i32, i32, i32
  }
}

</mosaic_0001>

<bundles_post_ra>
// kernel: tpu_custom_call.1
= control target key start
LH: loop header
LB: loop body
LE: loop exit
PB: predicated region body
PF: predicated region fallthrough
CT: control target
= control target key end

     0   :  { %s1909_s0 = inlined_call_operand.vmem [shape: f32[2,32,32], index: 0, kind: input, shape index: {}]   ;;  %s1910_s1 = inlined_call_operand.hbm [shape: f32[2,32,32], index: 1, kind: input, shape index: {}]   ;;  %s1911_s2 = inlined_call_operand.hbm [shape: f32[2,32,32], index: 2, kind: input, shape index: {}]   ;;  %s1912_s3 = inlined_call_operand.vmem [shape: f32[32,64], index: 3, kind: input, shape index: {}]   ;;  %s1913_s4 = inlined_call_operand.hbm [shape: f32[3,64], index: 4, kind: input, shape index: {}]   ;;  %s1914_s5 = inlined_call_operand.vmem [shape: f32[64,32], index: 5, kind: input, shape index: {}]   ;;  %s1915_s6 = inlined_call_operand.hbm [shape: f32[8,64], index: 6, kind: input, shape index: {}]   ;;  %s1916_s7 = inlined_call_operand.vmem [shape: f32[1,32], index: 7, kind: input, shape index: {}]   ;;  %s1917_s8 = inlined_call_operand.vmem [shape: f32[2], index: 8, kind: input, shape index: {}]   ;;  %s1918_s9 = inlined_call_operand.hbm [shape: f32[2,32,32], index: 9, kind: output, shape index: {}]  }
   0x1   :  { %1928 = sst [smem:[#allocation26_spill]] %s1913_s4 }
   0x2   :  { %1929 = sst [smem:[#allocation27_spill]] %s1914_s5 }
   0x3   :  { %1930 = sst [smem:[#allocation28_spill]] %s1915_s6 }
   0x4   :  { %1931 = sst [smem:[#allocation29_spill]] %s1916_s7 }
   0x5   :  { %1932 = sst [smem:[#allocation30_spill]] %s1917_s8 }
   0x6   :  { %1933 = sst [smem:[#allocation31_spill]] %s1918_s9 }
   0x7   :  { %14 = vsyncpa [#allocation3], 0 }
   0x8   :  { %16 = vsyncpa [#allocation3 + $0x1], 0 }
   0x9   :  { %17 = vsyncpa [#allocation7], 0 }
   0xa   :  { %19 = vsyncpa [#allocation7 + $0x1], 0 }
   0xb   :  { %20 = vsyncpa [#allocation10], 0 }
   0xc   :  { %21 = vsyncpa [#allocation5], 0 }
   0xd   :  { %22 = vsyncpa [#allocation4], 0 }
   0xe   :  { %24 = vsyncpa [#allocation4 + $0x1], 0  ;;  %s1528_s30 = smov 0   ;;  %s1530_s10 = smov 0  }
   0xf   :  { %s1532_s11 = smov 0   ;;  %s1534_s12 = smov 0  }
  0x10   :  { %s1536_s13 = smov 0   ;;  %s1538_s14 = smov 0  }
  0x11   :  { %s1540_s15 = smov 0   ;;  %s1542_s16 = smov 0  }
  0x12   :  { %s1544_s17 = smov 0   ;;  %s1546_s18 = smov 0  }
  0x13   :  { %s1548_s19 = smov 0  }
  0x14 LB: > { %1934 = sst [smem:[#allocation19_spill]] %s1444_s12  ;;  %s1584_s20 = sadd.s32 4294967295, %s1472_s19   ;;  %s1472_s19 = sphi %s1548_s19, %s30_s19   ;;  %s1468_s18 = sphi %s1546_s18, %s1959_s18   ;;  %s1464_s17 = sphi %s1544_s17, %s1966_s17   ;;  %s1460_s16 = sphi %s1542_s16, %s1957_s16   ;;  %s1456_s15 = sphi %s1540_s15, %s1965_s15   ;;  %s1452_s14 = sphi %s1538_s14, %s1956_s14   ;;  %s1448_s13 = sphi %s1536_s13, %s1964_s13   ;;  %s1444_s12 = sphi %s1534_s12, %s1963_s12   ;;  %s1440_s11 = sphi %s1532_s11, %s1962_s11   ;;  %s1436_s10 = sphi %s1530_s10, %s1961_s10   ;;  %s1432_s30 = sphi %s1528_s30, %s1960_s30  }
  0x15   : > { %1935 = sst [smem:[#allocation20_spill]] %s1452_s14  ;;  %p1003_p0 = scmp.ge.s32.totalorder %s1472_s19, 1 }
  0x16   : > { %1936 = sst [smem:[#allocation21_spill]] %s1468_s18  ;;  %p99_p1 = scmp.eq.s32.totalorder %s1584_s20, 0 }
  0x17   : > { %p297_p2 = scmp.lt.s32.totalorder %s1472_s19, 9  ;;  %s1937_s4 = sld [smem:[#allocation26_spill]] }
  0x18   : > { %s1474_s25 = smov [#allocation8]   ;;  %s1939_s6 = sld [smem:[#allocation28_spill]] }
  0x19   : > { %p1592_p3 = pnand %p1003_p0, %p297_p2  ;;  %s314_s26 = sshll.u32 %s1474_s25, 4  ;;  %s315_s26 = int_to_ptr.vmem [resolvable:$true] %s314_s26 }
  0x1a   : > { %s1940_s8 = sld [smem:[#allocation30_spill]]  ;;  %s1475_s9 = smov [#allocation9]  }
  0x1b   : > { %p1065_p4 = pneg %p1592_p3  ;;  %s329_s25 = sshll.u32 %s1475_s9, 4  ;;  %s330_s25 = int_to_ptr.vmem [resolvable:$true] %s329_s25 }
  0x1c   : > { %s1476_s27 = smov [#allocation11]   ;;  %s1000_s28 = sadd.s32 4294967294, %s1472_s19  }
  0x1d   : > { %s312_s23 = sshll.u32 %s1937_s4, 4  ;;  %p1066_p5 = pnand %p1065_p4, %p99_p1  ;;  %s313_s23 = int_to_ptr.hbm [resolvable:$true] %s312_s23 }
  0x1e   : > { %s327_s29 = sshll.u32 %s1939_s6, 4  ;;  %s39_s6 = sadd.s32 1, %s1464_s17  ;;  %s328_s29 = int_to_ptr.hbm [resolvable:$true] %s327_s29 }
  0x1f   : > { %1068 = dma.hbm_to_vmem [thread:$0]  (!%p1066_p5), %s313_s23, 64, %s315_s26, [#allocation7]  }
  0x20   : > { %s342_s4 = sshll.u32 %s1940_s8, 4  ;;  %p40_p6 = scmp.ge.s32.totalorder %s39_s6, 4  ;;  %s343_s4 = int_to_ptr.vmem [resolvable:$true] %s342_s4 }
  0x21   : > { %1071 = dma.hbm_to_vmem [thread:$0]  (!%p1066_p5), %s328_s29, 128, %s330_s25, [#allocation10]  }
  0x22   : > { %1074 = dma.vmem_to_smem (!%p1066_p5), %s343_s4, 16, %s1476_s27, [#allocation5]  }
  0x23   : > { %s42_s21 = sadd.s32 1, %s1468_s18  ;;  %s85_s22 = sadd.s32 1, %s1452_s14 }
  0x24   : > { %p92_p7 = scmp.ne.s32.totalorder %s1452_s14, %s1448_s13  ;;  %s1968_s21 = smov (!%p40_p6, %s42_s21), %s1468_s18 }
  0x25   : > { %s1612_s9 = scalar_select %p40_p6, 0, %s39_s6  }
  0x26   : > { %p93_p8 = scmp.eq.s32.totalorder %s1472_s19, 0  ;;  %p44_p9 = scmp.ge.s32.totalorder %s1968_s21, 2 }
  0x27   : > { %1941 = sst [smem:[#allocation22_spill]] %s1612_s9  ;;  %s81_s23 = ssub.s32 %s1464_s17, %s1612_s9 }
  0x28   : > { %p98_p10 = scmp.ne.s32.totalorder %s1448_s13, %s1444_s12  ;;  %p109_p11 = scmp.lt.s32.totalorder %s39_s6, 3 }
  0x29   : > { %s111_s4 = sadd.s32 1, %s1612_s9  ;;  %s1970_s21 = smov (%p44_p9, %s1968_s21), 0 }
  0x2a   : > { %1942 = sst [smem:[#allocation23_spill]] %s1970_s21  ;;  %p1628_p12 = por %p99_p1, %p98_p10 }
  0x2b   : > { %p112_p13 = scmp.lt.s32.totalorder %s111_s4, 3  ;;  %s80_s29 = ssub.s32 %s1468_s18, %s1970_s21 }
  0x2c   : > { %p284_p0 = scmp.eq.s32.totalorder %s1584_s20, 7  ;;  %s82_s25 = sor.u32 %s81_s23, %s80_s29 }
  0x2d   : > { %p290_p2 = scmp.eq.s32.totalorder %s1000_s28, 7  ;;  %p83_p4 = scmp.eq.s32.totalorder %s82_s25, 0 }
  0x2e   : > { %p1638_p5 = por %p284_p0, %p92_p7  ;;  %s1972_s6 = smov (!%p109_p11, %s39_s6), 3 }
  0x2f   : > { %s1643_s8 = scalar_select %p83_p4, %s1452_s14, %s85_s22  }
  0x30   : > { %s1944_s27 = scalar_select %p1638_p5, 1, 0 }
  0x31   : > { %1946 = sst [smem:[#allocation25_spill]] %s1643_s8  ;;  %s1974_s4 = smov (!%p112_p13, %s111_s4), 3 }
  0x32   : > { %1945 = sst [smem:[#allocation24_spill]] %s1944_s27  ;;  %p1650_p6 = por %p93_p8, %p92_p7 }
  0x33   : > { %p1657_p9 = por %p290_p2, %p98_p10  ;;  %s115_s23 = ssub.s32 %s1972_s6, %s1974_s4 }
  0x34   : > { %s370_s25 = sand.u32 1, %s1452_s14   ;;  %s116_s9 = sor.u32 %s115_s23, %s80_s29 }
  0x35   : > { %p1089_p11 = scmp.lt.s32.totalorder %s1472_s19, 8  ;;  %s1008_s22 = sshll.u32 %s370_s25, 3 }
  0x36   : > { %s1009_s8 = sshll.u32 %s1468_s18, 2  ;;  %s374_s7 = scalar_lea.vmem [#allocation2], %s1008_s22 }
  0x37   : > { %s378_s27 = sadd.s32 %s1464_s17, %s1009_s8  ;;  %s384_s12 = sshll.u32 %s374_s7, 4  ;;  %s385_s12 = int_to_ptr.vmem [resolvable:$true] %s384_s12 }
  0x38   : > { %s1010_s5 = sshll.u32 %s378_s27, 3  ;;  %p1076_p7 = pnand %p1089_p11, %p1650_p6 }
  0x39   : > { %s380_s29 = scalar_lea.hbm %s1910_s1, %s1010_s5  ;;  %p117_p10 = scmp.eq.s32.totalorder %s116_s9, 0 }
  0x3a   : > { %s382_s23 = sshll.u32 %s380_s29, 4  ;;  %s371_s18 = scalar_lea.sflag [#allocation3], %s370_s25  ;;  %s383_s23 = int_to_ptr.hbm [resolvable:$true] %s382_s23 }
  0x3b   : > { %1078 = dma.hbm_to_vmem [thread:$0]  (!%p1076_p7), %s383_s23, 128, %s385_s12, %s371_s18  }
  0x3c   : > { %s119_s22 = sadd.s32 1, %s1440_s11  ;;  %p126_p13 = scmp.ne.s32.totalorder %s1440_s11, %s1436_s10 }
  0x3d   : > { %s1676_s7 = scalar_select %p117_p10, %s1440_s11, %s119_s22  }
  0x3e   : > { %s402_s27 = sadd.s32 %s1009_s8, %s1972_s6  ;;  %p132_p0 = scmp.ne.s32.totalorder %s1436_s10, %s1432_s30 }
  0x3f   : > { %p128_p2 = por %p126_p13, %p93_p8  ;;  %s393_s14 = sand.u32 1, %s1440_s11  }
  0x40   : > { %p1685_p4 = por %p132_p0, %p99_p1  ;;  %s391_s21 = sand.u32 1, %s1472_s19  }
  0x41   : > { %s1011_s9 = sshll.u32 %s393_s14, 3  ;;  %s1013_s4 = sshll.u32 %s402_s27, 3 }
  0x42   : > { %s404_s18 = scalar_lea.hbm %s1911_s2, %s1013_s4  ;;  %s395_s23 = scalar_lea.vmem [#allocation6], %s1011_s9 }
  0x43   : > { %s406_s29 = sshll.u32 %s404_s18, 4  ;;  %s408_s22 = sshll.u32 %s395_s23, 4  ;;  %s407_s29 = int_to_ptr.hbm [resolvable:$true] %s406_s29  ;;  %s409_s22 = int_to_ptr.vmem [resolvable:$true] %s408_s22 }
  0x44   : > { %p1079_p8 = pnand %p1089_p11, %p128_p2  ;;  %s392_s6 = scalar_lea.sflag [#allocation7], %s391_s21 }
  0x45   : > { %417 = sbr.rel (%p1592_p3) target bundleno = 704 (0x2c0), region = 56  ;;  %s1698_s8 = sand.u32 (!%p1592_p3), 1, %s1448_s13  }
  0x46   : > { %1081 = dma.hbm_to_vmem [thread:$0]  (!%p1079_p8), %s407_s29, 128, %s409_s22, %s392_s6  }
  0x47   : > { %s1015_s30 = sshll.u32 (!%p1592_p3), %s1698_s8, 3  ;;  %s420_s27 = scalar_lea.sflag (!%p1592_p3), [#allocation3], %s1698_s8 }
  0x48   : > { %s1704_s14 = scalar_lea.vmem (!%p1592_p3), [#allocation2], %s1015_s30 }
  0x4a   : > { %1407 = dma.done.wait (%p1628_p12), %s420_s27, 128  }
  0x4b   : > { %1409 = vsyncadd (%p1628_p12), %s420_s27, 4294967168  ;;  %s429_s24 = sand.u32 1, %s1584_s20   ;;  %s431_s21 = sand.u32 1, %s1436_s10  }
  0x4c   : > { %s1712_s9 = sshll.u32 %s431_s21, 3  ;;  %s430_s4 = scalar_lea.sflag [#allocation7], %s429_s24 }
  0x4d   : > { %s433_s25 = scalar_lea.vmem [#allocation6], %s1712_s9 }
  0x4e   : > { %1411 = dma.done.wait (%p1685_p4), %s430_s4, 128  }
  0x4f   : > { %1413 = vsyncadd (%p1685_p4), %s430_s4, 4294967168 }
  0x50   : > { %1415 = dma.done.wait (%p99_p1), [#allocation7], 64  }
  0x51   : > { %1417 = vsyncadd (%p99_p1), [#allocation7], 4294967232 }
  0x52   : > { %1419 = dma.done.wait (%p99_p1), [#allocation10], 128  }
  0x53   : > { %1421 = vsyncadd (%p99_p1), [#allocation10], 4294967168 }
  0x54   : > { %1423 = dma.done.wait (%p99_p1), [#allocation5], 16  }
  0x55   : > { %1425 = vsyncadd (%p99_p1), [#allocation5], 4294967280 }
  0x56   : > { %454 = sfence }
  0x57   : > { %v525_v0 = vld [vmem:[%s1912_s3 + $0x18] sm:$0xff]  ;;  %v524_v1 = vld [vmem:[%s1912_s3 + $0x10] sm:$0xff]  ;;  %s1021_s29 = sadd.s32 4294967295, %s1456_s15  ;;  %p504_p3 = scmp.lt.s32.totalorder %s1460_s16, 1  ;;  %v523_v2 = vld [vmem:[%s1912_s3 + $0x8] sm:$0xff]  ;;  %vm527_vm0 = vcmask 261120   ;;  %v665_v54 = vlaneseq }
  0x58   : > { %1043 = vmatpush.msra.mxu2 %v525_v0  ;;  %549 = vmatpush.msra.mxu0 %v525_v0  ;;  %p502_p12 = scmp.gt.s32.totalorder %s1021_s29, 0  ;;  %p1022_p6 = scmp.lt.s32.totalorder %s1021_s29, 3  ;;  %v522_v3 = vld [vmem:[%s1912_s3] sm:$0xff]  ;;  %v520_v6 = vld [vmem:[%s433_s25] sm:$0xff]  ;;  %vm574_vm2 = vcmask 523264   ;;  %v1477_v31 = vmov 64.0  }
  0x59   : > { %s505_s22 = scalar_select %p504_p3, %s1460_s16, 1  ;;  %v1747_v4 = vld [vmem:[%s1704_s14] sm:$0xff]  ;;  %1187 = vrcp.f32 %v1477_v31  ;;  %v666_v60 = vshrl.u32 %v665_v54, 7 }
  0x5a   : > { %1044 = vmatpush.msra.mxu2 %v524_v1  ;;  %550 = vmatpush.msra.mxu0 %v524_v1  ;;  %s1976_s29 = smov (!%p502_p12, %s1021_s29), 0  ;;  %s563_s14 = sld [smem:[#allocation11]]  ;;  %v1758_v7 = vld [vmem:[#allocation9] sm:$0xff] }
  0x5b   : > { %s1027_s24 = sshll.u32 %s505_s22, 2  ;;  %s1978_s29 = smov (!%p1022_p6, %s1976_s29), 3  ;;  %v526_v8 = vperm.slane %v1758_v7, 0 }
  0x5c   : > { %1045 = vmatpush.msra.mxu2 %v523_v2  ;;  %551 = vmatpush.msra.mxu0 %v523_v2  ;;  %s509_s21 = sadd.s32 %s1978_s29, %s1027_s24  ;;  %s1032_s9 = sshll.u32 %s1456_s15, 3  ;;  %v667_v2 = vadd.s32 8, %v666_v60 }
  0x5d   : > { %s1028_s4 = sshll.u32 %s509_s21, 3  ;;  %s1033_s25 = sadd.s32 4294967288, %s1032_s9 }
  0x5e   : > { %1046 = vmatpush.msra.mxu2 %v522_v3  ;;  %552 = vmatpush.msra.mxu0 %v522_v3  ;;  %s511_s12 = scalar_lea.vmem %s1909_s0, %s1028_s4  ;;  %v671_v3 = vstv %s1033_s25  ;;  %s1804_s18 = sld [smem:[#allocation11 + $0x1]] }
  0x5f   : > { %1030 = vmatmul.msk.f32.vlgmr.msra.gmra.mxu2 %vm527_vm0, %v1747_v4  ;;  %v519_v5 = vld [vmem:[%s511_s12] sm:$0xff]  ;;  %v1188_v32 = vpop.eup %1187  ;;  %s1950_s23 = sld [smem:[#allocation27_spill]]  ;;  %s1037_s20 = sshll.u32 %s1460_s16, 2 }
  0x60   : > { %1029 = vmatmul.msk.f32.vlgmr.msra.gmra.mxu0 %vm527_vm0, %v519_v5  ;;  %v567_v10 = vstv %s563_s14  ;;  %v585_v33 = vmul.f32 64.0, %v1188_v32  ;;  %vm589_vm5 = vweird.f32 %v1188_v32  ;;  %s833_s22 = sadd.s32 %s1456_s15, %s1037_s20  ;;  %s1951_s21 = sld [smem:[#allocation29_spill]] }
  0x61   : > { %s1038_s6 = sshll.u32 %s833_s22, 3  ;;  %s1952_s5 = sld [smem:[#allocation31_spill]] }
  0x62   : > { %v586_v34 = vsub.f32 1.0, %v585_v33  ;;  %s500_s9 = scalar_lea.vmem [#allocation12], %s1015_s30  ;;  %s823_s15 = scalar_lea.sflag [#allocation4], %s1698_s8 }
  0x63   : > { %s837_s25 = sshll.u32 %s500_s9, 4  ;;  %s838_s25 = int_to_ptr.vmem [resolvable:$true] %s837_s25 }
  0x64   : > { %v587_v35 = vmul.f32 %v1188_v32, %v586_v34 }
  0x66   : > { %v588_v36 = vadd.f32 %v1188_v32, %v587_v35 }
  0x67   : > { %1031 = vmatmul.msk.f32.gmra.mxu2 %vm527_vm0, %v520_v6  ;;  %s835_s14 = scalar_lea.hbm %s1952_s5, %s1038_s6  ;;  %s1354_s30 = scalar_lea.hbm %s1952_s5, 64 }
  0x68   : > { %v1782_v39 = vsel %vm589_vm5, %v1188_v32, %v588_v36 }
  0xdd   : > { %v554_v9 = vpop.f32.mrf.mxu0 }
  0xde   : > { %v555_v11 = vadd.f32 %v554_v9, %v526_v8 }
  0xe0   : > { %v568_v12 = vmul.f32 %v567_v10, %v555_v11  ;;  %vm564_vm1 = vcmp.ge.f32.partialorder %v555_v11, 0.0 }
  0xe2   : > { %v557_v13 = vpop.f32.mrf.mxu2  ;;  %v1761_v15 = vsel %vm564_vm1, %v555_v11, %v568_v12  ;;  %v673_v11 = vadd.s32 %v671_v3, %v667_v2 }
  0xe3   : > { %v558_v14 = vadd.f32 %v557_v13, %v526_v8  ;;  %v575_v17 = vsel %vm574_vm2, %v1761_v15, 0.0  ;;  %v594_v29 = vmul.f32 %v1761_v15, %v1761_v15 }
  0xe4   : > { %576 = vadd.xlane.f32.xlu1 %v575_v17  ;;  %v657_v17 = vperm.slane %v1758_v7, 1  ;;  %vm676_vm9 = vcmp.ge.s32.totalorder %v673_v11, 0  ;;  %vm679_vm10 = vcmp.lt.s32.totalorder %v673_v11, 32 }
  0xe5   : > { %v569_v16 = vmul.f32 %v567_v10, %v558_v14  ;;  %vm565_vm3 = vcmp.ge.f32.partialorder %v558_v14, 0.0  ;;  %v597_v30 = vsel %vm574_vm2, %v594_v29, 0.0  ;;  %vm682_vm13 = vmand %vm676_vm9, %vm679_vm10 }
  0xe7   : > { %v1765_v18 = vsel %vm565_vm3, %v558_v14, %v569_v16  ;;  %v668_v14 = vadd.s32 16, %v666_v60 }
  0xe8   : > { %v578_v19 = vsel %vm574_vm2, %v1765_v18, 0.0  ;;  %v595_v20 = vmul.f32 %v1765_v18, %v1765_v18 }
  0xe9   : > { %579 = vadd.xlane.f32.xlu0 %v578_v19 }
  0xea   : > { %v560_v21 = vpop.f32.mrf.mxu2  ;;  %v600_v24 = vsel %vm574_vm2, %v595_v20, 0.0 }
  0xeb   : > { %v561_v22 = vadd.f32 %v560_v21, %v526_v8  ;;  %v661_v21 = vperm.slane %v1758_v7, 2 }
  0xec   : > { %601 = vadd.xlane.f32.xlu1 %v600_v24  ;;  %v687_v24 = vld [vmem:[#allocation8] sm:$0x7] }
  0xed   : > { %v570_v23 = vmul.f32 %v567_v10, %v561_v22  ;;  %vm566_vm4 = vcmp.ge.f32.partialorder %v561_v22, 0.0  ;;  %v691_v31 = vperm.slane %v687_v24, 1 }
  0xef   : > { %v1772_v25 = vsel %vm566_vm4, %v561_v22, %v570_v23 }
  0xf0   : > { %v581_v26 = vsel %vm574_vm2, %v1772_v25, 0.0  ;;  %v596_v27 = vmul.f32 %v1772_v25, %v1772_v25 }
  0xf1   : > { %582 = vadd.xlane.f32.xlu0 %v581_v26 }
  0xf2   : > { %v603_v28 = vsel %vm574_vm2, %v596_v27, 0.0  ;;  %v674_v27 = vadd.s32 %v671_v3, %v668_v14 }
  0xf3   : > { %604 = vadd.xlane.f32.xlu2 %v603_v28 }
  0xf4   : > { %vm677_vm15 = vcmp.ge.s32.totalorder %v674_v27, 0  ;;  %vm680_vm1 = vcmp.lt.s32.totalorder %v674_v27, 32  ;;  %v783_v27 = vld [vmem:[%s1950_s23 + $0x18] sm:$0xff] }
  0xf5   : > { %vm683_vm4 = vmand %vm677_vm15, %vm680_vm1 }
  0xfb   : > { %598 = vadd.xlane.f32.xlu2 %v597_v30 }
 0x157   : > { %v577_v37 = vpop.xlane.xlu1 %576 }
 0x158   : > { %v1793_v55 = vmul.f32 %v1782_v39, %v577_v37 }
 0x15a   : > { %v609_v58 = vmul.f32 %v1793_v55, %v1793_v55 }
 0x15c   : > { %v580_v38 = vpop.xlane.xlu0 %579 }
 0x15d   : > { %v592_v40 = vmul.f32 %v1782_v39, %v580_v38  ;;  %v698_v38 = vperm.slane %v687_v24, 2 }
 0x15f   : > { %v602_v41 = vpop.xlane.xlu1 %601  ;;  %v610_v42 = vmul.f32 %v592_v40, %v592_v40  ;;  %v619_v16 = vsub.f32 %v1765_v18, %v592_v40 }
 0x160   : > { %v607_v43 = vmul.f32 %v602_v41, %v1782_v39 }
 0x162   : > { %v613_v44 = vsub.f32 %v607_v43, %v610_v42 }
 0x164   : > { %v583_v45 = vpop.xlane.xlu0 %582  ;;  %v616_v47 = vmax.f32 %v613_v44, 0.0  ;;  %v688_v44 = vperm.slane %v687_v24, 0 }
 0x165   : > { %v1787_v46 = vmul.f32 %v1782_v39, %v583_v45  ;;  %v672_v45 = vadd.s32 %v671_v3, %v666_v60 }
 0x166   : > { %v605_v48 = vpop.xlane.xlu2 %604  ;;  %v622_v51 = vadd.f32 1e-05, %v616_v47  ;;  %v618_v47 = vsub.f32 %v1761_v15, %v1793_v55 }
 0x167   : > { %v611_v49 = vmul.f32 %v1787_v46, %v1787_v46  ;;  %v608_v50 = vmul.f32 %v605_v48, %v1782_v39  ;;  %v620_v18 = vsub.f32 %v1772_v25, %v1787_v46  ;;  %vm678_vm9 = vcmp.lt.s32.totalorder %v672_v45, 32 }
 0x168   : > { %1189 = vrsqrt.f32 %v622_v51  ;;  %vm640_vm7 = vweird.f32 %v622_v51 }
 0x169   : > { %v614_v52 = vsub.f32 %v608_v50, %v611_v49 }
 0x16b   : > { %v617_v53 = vmax.f32 %v614_v52, 0.0 }
 0x16d   : > { %v623_v56 = vadd.f32 1e-05, %v617_v53 }
 0x16e   : > { %v599_v57 = vpop.xlane.xlu2 %598  ;;  %v1190_v61 = vpop.eup %1189 }
 0x16f   : > { %1191 = vrsqrt.f32 %v623_v56  ;;  %v606_v59 = vmul.f32 %v599_v57, %v1782_v39  ;;  %v635_v62 = vmul.f32 %v1190_v61, %v622_v51  ;;  %vm641_vm6 = vweird.f32 %v1190_v61 }
 0x170   : > { %vm642_vm8 = vmor %vm640_vm7, %vm641_vm6  ;;  %vm650_vm12 = vweird.f32 %v623_v56  ;;  %vm703_vm7 = vcmask 1045504  }
 0x171   : > { %v612_v63 = vsub.f32 %v606_v59, %v609_v58  ;;  %v636_v0 = vmul.f32 %v1190_v61, %v635_v62  ;;  %v711_v59 = vperm.slane %v1758_v7, 3 }
 0x173   : > { %v615_v1 = vmax.f32 %v612_v63, 0.0  ;;  %v637_v6 = vmul.f32 0.5, %v636_v0 }
 0x175   : > { %v1192_v5 = vpop.eup %1191  ;;  %v621_v8 = vadd.f32 1e-05, %v615_v1  ;;  %v638_v10 = vsub.f32 1.5, %v637_v6 }
 0x176   : > { %v645_v9 = vmul.f32 %v1192_v5, %v623_v56  ;;  %vm651_vm11 = vweird.f32 %v1192_v5 }
 0x177   : > { %1193 = vrsqrt.f32 %v621_v8  ;;  %v639_v13 = vmul.f32 %v1190_v61, %v638_v10  ;;  %vm652_vm14 = vmor %vm650_vm12, %vm651_vm11  ;;  %vm630_vm5 = vweird.f32 %v621_v8  ;;  %vm726_vm12 = vcmask 522240  }
 0x178   : > { %v646_v12 = vmul.f32 %v1192_v5, %v645_v9 }
 0x179   : > { %v643_v20 = vsel %vm642_vm8, %v1190_v61, %v639_v13  ;;  %vm675_vm8 = vcmp.ge.s32.totalorder %v672_v45, 0  ;;  %v717_v61 = vstv %s1804_s18  ;;  %s839_s18 = sshll.u32 %s835_s14, 4  ;;  %s840_s18 = int_to_ptr.hbm [resolvable:$true] %s839_s18 }
 0x17a   : > { %v647_v19 = vmul.f32 0.5, %v646_v12  ;;  %v655_v22 = vmul.f32 %v643_v20, %v619_v16  ;;  %vm681_vm10 = vmand %vm675_vm8, %vm678_vm9  ;;  %s1348_s16 = sshra.s32 %s840_s18, 4  ;;  %s1349_s16 = int_to_ptr.hbm [resolvable:$true] %s1348_s16 }
 0x17b   : > { %s1350_s29 = scalar_lea.hbm %s1349_s16, 8  ;;  %p1355_p10 = scmp.lt.s32.totalorder %s1349_s16, %s1952_s5 }
 0x17c   : > { %v648_v23 = vsub.f32 1.5, %v647_v19  ;;  %v659_v28 = vmul.f32 %v657_v17, %v655_v22  ;;  %v786_v19 = vld [vmem:[%s1950_s23 + $0x30] sm:$0xff]  ;;  %p1351_p1 = scmp.ne.s32.totalorder %s1349_s16, %s1350_s29  ;;  %p1356_p13 = scmp.lt.s32.totalorder %s1354_s30, %s1350_s29 }
 0x17d   : > { %v1194_v26 = vpop.eup %1193 }
 0x17e   : > { %v649_v29 = vmul.f32 %v1192_v5, %v648_v23  ;;  %v625_v30 = vmul.f32 %v1194_v26, %v621_v8  ;;  %v663_v32 = vadd.f32 %v661_v21, %v659_v28  ;;  %vm631_vm3 = vweird.f32 %v1194_v26  ;;  %p1352_p11 = pnand %p1351_p1, %p1638_p5  ;;  %p1357_p0 = por %p1356_p13, %p1355_p10 }
 0x17f   : > { %vm632_vm6 = vmor %vm630_vm5, %vm631_vm3 }
 0x180   : > { %v653_v33 = vsel %vm652_vm14, %v1192_v5, %v649_v29  ;;  %v626_v34 = vmul.f32 %v1194_v26, %v625_v30  ;;  %v685_v37 = vsel %vm682_vm13, %v663_v32, 0.0  ;;  %vm722_vm14 = vcmask 523271   ;;  %v782_v30 = vld [vmem:[%s1950_s23 + $0x10] sm:$0xff]  ;;  %v781_v32 = vld [vmem:[%s1950_s23 + $0x8] sm:$0xff]  ;;  %p1353_p7 = pneg %p1352_p11 }
 0x181   : > { %v656_v35 = vmul.f32 %v653_v33, %v620_v18  ;;  %v692_v41 = vmul.f32 %v691_v31, %v685_v37  ;;  %v699_v46 = vmul.f32 %v698_v38, %v685_v37  ;;  %v690_v53 = vmul.f32 %v688_v44, %v685_v37 }
 0x182   : > { %v627_v36 = vmul.f32 0.5, %v626_v34  ;;  %p1358_p2 = pnand %p1357_p0, %p1353_p7 }
 0x183   : > { %v660_v40 = vmul.f32 %v657_v17, %v656_v35  ;;  %v694_v49 = vrot.slane %v692_v41, 1  ;;  %v704_v54 = vrot.slane %v699_v46, 2  ;;  %v780_v35 = vld [vmem:[%s1950_s23] sm:$0xff] }
 0x184   : > { %v628_v42 = vsub.f32 1.5, %v627_v36 }
 0x185   : > { %v664_v43 = vadd.f32 %v661_v21, %v660_v40  ;;  %v697_v58 = vadd.f32 %v694_v49, %v690_v53 }
 0x186   : > { %v629_v25 = vmul.f32 %v1194_v26, %v628_v42 }
 0x187   : > { %v686_v48 = vsel %vm683_vm4, %v664_v43, 0.0 }
 0x188   : > { %v633_v50 = vsel %vm632_vm6, %v1194_v26, %v629_v25  ;;  %v700_v51 = vmul.f32 %v698_v38, %v686_v48  ;;  %v784_v26 = vld [vmem:[%s1950_s23 + $0x20] sm:$0xff] }
 0x189   : > { %v654_v52 = vmul.f32 %v633_v50, %v618_v47 }
 0x18a   : > { %v705_v56 = vrot.slane %v700_v51, 2 }
 0x18b   : > { %v658_v57 = vmul.f32 %v657_v17, %v654_v52  ;;  %v787_v17 = vld [vmem:[%s1950_s23 + $0x38] sm:$0xff] }
 0x18c   : > { %v706_v60 = vsel %vm703_vm7, %v704_v54, %v705_v56  ;;  %808 = vmatpush.msra.mxu1 %v787_v17  ;;  %vm794_vm7 = vcmask 1040384  }
 0x18d   : > { %v710_v15 = vadd.f32 %v706_v60, %v697_v58  ;;  %v662_v55 = vadd.f32 %v661_v21, %v658_v57  ;;  %v785_v21 = vld [vmem:[%s1950_s23 + $0x28] sm:$0xff]  ;;  %v777_v60 = vperm.slane %v1758_v7, 5 }
 0x18e   : > { %809 = vmatpush.msra.mxu1 %v786_v19 }
 0x18f   : > { %v713_v62 = vadd.f32 %v711_v59, %v710_v15  ;;  %v684_v63 = vsel %vm681_vm10, %v662_v55, 0.0 }
 0x190   : > { %v689_v0 = vmul.f32 %v688_v44, %v684_v63  ;;  %810 = vmatpush.msra.mxu1 %v785_v21 }
 0x191   : > { %vm716_vm11 = vcmp.ge.f32.partialorder %v713_v62, 0.0  ;;  %v719_v1 = vmul.f32 %v717_v61, %v713_v62 }
 0x192   : > { %v696_v2 = vadd.f32 %v694_v49, %v689_v0  ;;  %811 = vmatpush.msra.mxu1 %v784_v26 }
 0x193   : > { %v1810_v3 = vsel %vm716_vm11, %v713_v62, %v719_v1 }
 0x194   : > { %v727_v5 = vsel %vm726_vm12, %v1810_v3, 0.0  ;;  %v709_v6 = vadd.f32 %v704_v54, %v696_v2  ;;  %v733_v14 = vmul.f32 %v1810_v3, %v1810_v3  ;;  %812 = vmatpush.msra.mxu1 %v783_v27  ;;  %v774_v54 = vperm.slane %v1758_v7, 4  ;;  %v1186_v7 = vld [vmem:[%s1951_s21] ss:$0 sm:$0xff] }
 0x195   : > { %728 = vadd.xlane.f32.xlu1 %v727_v5 }
 0x196   : > { %v712_v8 = vadd.f32 %v711_v59, %v709_v6  ;;  %v737_v16 = vsel %vm726_vm12, %v733_v14, 0.0  ;;  %813 = vmatpush.msra.mxu1 %v782_v30 }
 0x198   : > { %vm715_vm13 = vcmp.ge.f32.partialorder %v712_v8, 0.0  ;;  %v718_v9 = vmul.f32 %v717_v61, %v712_v8  ;;  %814 = vmatpush.msra.mxu1 %v781_v32 }
 0x19a   : > { %v720_v10 = vsel %vm715_vm13, %v712_v8, %v718_v9  ;;  %815 = vmatpush.msra.mxu1 %v780_v35 }
 0x19b   : > { %v723_v11 = vsel %vm722_vm14, %v720_v10, 0.0  ;;  %v732_v12 = vmul.f32 %v720_v10, %v720_v10 }
 0x19c   : > { %724 = vadd.xlane.f32.xlu0 %v723_v11 }
 0x19d   : > { %v734_v13 = vsel %vm722_vm14, %v732_v12, 0.0 }
 0x19e   : > { %735 = vadd.xlane.f32.xlu2 %v734_v13 }
 0x1a4   : > { %738 = vadd.xlane.f32.xlu0 %v737_v16 }
 0x208   : > { %v729_v23 = vpop.xlane.xlu1 %728 }
 0x209   : > { %v731_v18 = vmul.f32 %v729_v23, %v1782_v39 }
 0x20b   : > { %v743_v36 = vmul.f32 %v731_v18, %v731_v18  ;;  %v749_v58 = vsub.f32 %v1810_v3, %v731_v18 }
 0x20f   : > { %v725_v20 = vpop.xlane.xlu0 %724 }
 0x210   : > { %v730_v22 = vmul.f32 %v725_v20, %v1782_v39 }
 0x211   : > { %v736_v24 = vpop.xlane.xlu2 %735 }
 0x212   : > { %v742_v28 = vmul.f32 %v730_v22, %v730_v22  ;;  %v740_v29 = vmul.f32 %v736_v24, %v1782_v39  ;;  %v748_v51 = vsub.f32 %v720_v10, %v730_v22 }
 0x214   : > { %v744_v31 = vsub.f32 %v740_v29, %v742_v28 }
 0x216   : > { %v746_v33 = vmax.f32 %v744_v31, 0.0 }
 0x217   : > { %v739_v34 = vpop.xlane.xlu0 %738 }
 0x218   : > { %v750_v37 = vadd.f32 1e-05, %v746_v33  ;;  %v741_v38 = vmul.f32 %v739_v34, %v1782_v39 }
 0x21a   : > { %1195 = vrsqrt.f32 %v750_v37  ;;  %v745_v40 = vsub.f32 %v741_v38, %v743_v36  ;;  %vm758_vm1 = vweird.f32 %v750_v37 }
 0x21c   : > { %v747_v41 = vmax.f32 %v745_v40, 0.0 }
 0x21e   : > { %v751_v42 = vadd.f32 1e-05, %v747_v41 }
 0x220   : > { %v1196_v43 = vpop.eup %1195  ;;  %1197 = vrsqrt.f32 %v751_v42  ;;  %vm768_vm5 = vweird.f32 %v751_v42 }
 0x221   : > { %v753_v44 = vmul.f32 %v1196_v43, %v750_v37  ;;  %vm759_vm15 = vweird.f32 %v1196_v43 }
 0x222   : > { %vm760_vm3 = vmor %vm758_vm1, %vm759_vm15 }
 0x223   : > { %v754_v45 = vmul.f32 %v1196_v43, %v753_v44 }
 0x225   : > { %v755_v25 = vmul.f32 0.5, %v754_v45 }
 0x226   : > { %v1198_v46 = vpop.eup %1197 }
 0x227   : > { %v756_v47 = vsub.f32 1.5, %v755_v25  ;;  %v763_v48 = vmul.f32 %v1198_v46, %v751_v42  ;;  %vm769_vm4 = vweird.f32 %v1198_v46 }
 0x228   : > { %vm770_vm6 = vmor %vm768_vm5, %vm769_vm4 }
 0x229   : > { %v757_v49 = vmul.f32 %v1196_v43, %v756_v47  ;;  %v764_v50 = vmul.f32 %v1198_v46, %v763_v48 }
 0x22b   : > { %v761_v39 = vsel %vm760_vm3, %v1196_v43, %v757_v49  ;;  %v765_v52 = vmul.f32 0.5, %v764_v50 }
 0x22c   : > { %v772_v53 = vmul.f32 %v761_v39, %v748_v51 }
 0x22d   : > { %v766_v56 = vsub.f32 1.5, %v765_v52 }
 0x22e   : > { %v775_v59 = vmul.f32 %v774_v54, %v772_v53 }
 0x22f   : > { %v767_v57 = vmul.f32 %v1198_v46, %v766_v56 }
 0x230   : > { %v778_v62 = vadd.f32 %v777_v60, %v775_v59 }
 0x231   : > { %v771_v15 = vsel %vm770_vm6, %v1198_v46, %v767_v57 }
 0x232   : > { %v773_v55 = vmul.f32 %v771_v15, %v749_v58  ;;  %v795_v0 = vrot.slane %v778_v62, 7 }
 0x234   : > { %v776_v61 = vmul.f32 %v774_v54, %v773_v55 }
 0x236   : > { %v779_v63 = vadd.f32 %v777_v60, %v776_v61 }
 0x238   : > { %v796_v1 = vrot.slane %v779_v63, 7 }
 0x23a   : > { %v797_v2 = vsel %vm794_vm7, %v795_v0, %v796_v1 }
 0x23b   : > { %1035 = vmatmul.msk.f32.vlgmr.msra.gmra.mxu1 %vm574_vm2, %v797_v2 }
 0x2b8   : > { %v817_v3 = vpop.f32.mrf.mxu1 }
 0x2b9   : > { %v818_v5 = vadd.f32 %v1186_v7, %v817_v3 }
 0x2bb   : > { %v820_v6 = vadd.f32 %v818_v5, %v1747_v4 }
 0x2bd   : > { %821 = vst.msk [vmem:[%s500_s9] sm:$0xff] %vm527_vm0, %v820_v6 }
 0x2be   : > { %1361 = shalt.err (!%p1358_p2)
}
 0x2bf   : > { %1063 = dma.vmem_to_hbm [thread:$0]  (%p1638_p5), %s838_s25, 128, %s840_s18, %s823_s15  }
 0x2c0 PF: > { %s1954_s8 = sld [smem:[#allocation19_spill]]  ;;  %p1093_p4 = scmp.ge.s32.totalorder %s1472_s19, 2 }
 0x2c2   : > { %p1083_p8 = pnand %p1093_p4, %p1657_p9 }
 0x2c4   : > { %p1084_p3 = pneg %p1083_p8 }
 0x2c6   : > { %s851_s24 = sand.u32 1, %s1954_s8  }
 0x2c7   : > { %s852_s21 = scalar_lea.sflag [#allocation4], %s851_s24 }
 0x2c8   : > { %1427 = dma.done.wait (%p1084_p3), %s852_s21, 128  }
 0x2c9   : > { %1429 = vsyncadd (%p1084_p3), %s852_s21, 4294967168  ;;  %s30_s19 = sadd.s32 1, %s1472_s19   ;;  %s1955_s4 = sld [smem:[#allocation20_spill]] }
 0x2ca   : > { %p27_p12 = scmp.ge.s32.totalorder %s30_s19, 10   ;;  %s1956_s14 = sld [smem:[#allocation25_spill]] }
 0x2cb   : > { %s1957_s16 = sld [smem:[#allocation21_spill]]  ;;  %s1960_s30 = smov %s1436_s10 }
 0x2cc   : > { %s1958_s26 = sld [smem:[#allocation22_spill]]  ;;  %s1961_s10 = smov %s1440_s11 }
 0x2cd   : > { %s1959_s18 = sld [smem:[#allocation23_spill]]  ;;  %s1962_s11 = smov %s1676_s7 }
 0x2ce   : > { %s1963_s12 = smov %s1448_s13  ;;  %s1965_s15 = smov %s1464_s17 }
 0x2cf   : > { %s1964_s13 = smov %s1955_s4  ;;  %29 = sbr.rel (!%p27_p12) target bundleno = 20 (0x14), region = 130 }
 0x2d2   : > { %s1966_s17 = smov %s1958_s26 }
 0x2d4   :  { %858 = vsyncpa [#allocation3], 1 }
 0x2d5   :  { %860 = vsyncpa [#allocation3 + $0x1], 1 }
 0x2d6   :  { %861 = vsyncpa [#allocation7], 1 }
 0x2d7   :  { %863 = vsyncpa [#allocation7 + $0x1], 1 }
 0x2d8   :  { %864 = vsyncpa [#allocation10], 1 }
 0x2d9   :  { %865 = vsyncpa [#allocation4], 1 }
 0x2da   :  { %867 = vsyncpa [#allocation4 + $0x1], 1 }
 0x2db   :  { %868 = vsyncpa [#allocation5], 1 }
 0x2dc   :  { %870 = vsyncpa [#allocation5 + $0x1], 1 }

</bundles_post_ra>
